<compile_context>
chip_gen: v7x
topology: tpu7x:2x2x1
jax: 0.10.0
libtpu: 0.0.40
codegen_flags: <defaults>
</compile_context>

<pallas_src>
import functools

import jax
import jax.numpy as jnp
from jax import lax
from jax.experimental import pallas as pl
from jax.experimental.pallas import tpu as pltpu

N_PAD = 128       # lane-dense classifier slab width (>= 5 classes)
T_SP_MAX = 2048   # spatial-tile cap: keeps double-buffered x blocks tiny even
                  # on v5e's 16 MiB scoped VMEM / v7x's 64 MiB physical VMEM


def _spatial_tile(hw: int) -> int:
    """Largest multiple-of-128 divisor of hw that is <= T_SP_MAX (or hw itself)."""
    if hw <= T_SP_MAX or hw % 128 != 0:
        return hw
    t = T_SP_MAX - (T_SP_MAX % 128)
    while hw % t != 0:
        t -= 128
    return t


def _net_kernel(x_ref, wconv_t_ref, wcls_ref, bcls_ref, out_ref, acc_ref,
                *, inv_hw: float):
    # x_ref:       (1, C_in, T_sp)   native NCHW slice (spatial tile lane-dense)
    # wconv_t_ref: (C_feat, C_in)    1x1-conv "backbone" weights, (out, in)
    # wcls_ref:    (C_feat, N_PAD)   zero-padded classifier weights
    # bcls_ref:    (1, N_PAD)        zero-padded classifier bias
    # out_ref:     (1, 1, N_PAD)     padded logits for this batch element
    # acc_ref:     (1, C_feat) f32   pooled-sum accumulator (persists over s)
    s = pl.program_id(1)

    @pl.when(s == 0)
    def _init():
        acc_ref[...] = jnp.zeros_like(acc_ref)

    # "backbone": pointwise channel mix + ReLU.  Standard NN matmul with the
    # long spatial axis lane-dense: (C_feat, C_in) @ (C_in, T_sp).
    # TODO(synk): at real EfficientNet sizes cast both operands to bf16 here.
    x_blk = x_ref[0]                                              # (C_in, T_sp)
    feat_t = jnp.dot(wconv_t_ref[...], x_blk,
                     preferred_element_type=jnp.float32)          # (C_feat, T_sp)
    feat_t = jnp.maximum(feat_t, 0.0)

    # Partial spatial sum, produced directly in row orientation (1, C_feat) via
    # an NT matmul with a ones row (contraction over the lane-dense T_sp axis),
    # so the finalize classifier matmul needs no transpose/relayout.
    ones_row = jnp.ones((1, feat_t.shape[1]), jnp.float32)
    partial = lax.dot_general(ones_row, feat_t,
                              dimension_numbers=(((1,), (1,)), ((), ())),
                              preferred_element_type=jnp.float32)  # (1, C_feat)
    acc_ref[...] += partial

    @pl.when(s == pl.num_programs(1) - 1)
    def _finalize():
        pooled = acc_ref[...] * inv_hw                             # (1, C_feat)
        logits = jnp.dot(pooled, wcls_ref[...],
                         preferred_element_type=jnp.float32) + bcls_ref[...]
        out_ref[0] = logits.astype(out_ref.dtype)                  # (1, N_PAD)


@jax.jit
def net_forward(x_nchw, w_conv, w_cls, b_cls):
    """x_nchw: (B, C_in, H, W) float32 -> logits (B, n_classes)."""
    B, C_in, H, W = x_nchw.shape
    C_feat = w_conv.shape[1]
    n_classes = w_cls.shape[1]
    HW = H * W
    T_sp = _spatial_tile(HW)
    n_sp = HW // T_sp

    # Free view: NCHW -> (B, C_in, H*W).  No activation transpose; the layout
    # is handled by the kernel's contraction over C_in.
    x_flat = x_nchw.reshape(B, C_in, HW)

    # Tiny weight-side glue (hoisted under jit): (out, in) conv weight and the
    # classifier padded to a 128-lane slab.
    w_conv_t = jnp.transpose(w_conv)                               # (C_feat, C_in)
    w_cls_pad = jnp.zeros((C_feat, N_PAD), w_cls.dtype).at[:, :n_classes].set(w_cls)
    b_cls_pad = jnp.zeros((1, N_PAD), b_cls.dtype).at[0, :n_classes].set(b_cls)

    kernel = functools.partial(_net_kernel, inv_hw=1.0 / HW)

    out_pad = pl.pallas_call(
        kernel,
        out_shape=jax.ShapeDtypeStruct((B, 1, N_PAD), jnp.float32),
        grid_spec=pltpu.PrefetchScalarGridSpec(
            num_scalar_prefetch=0,
            grid=(B, n_sp),                      # (parallel batch, spatial reduction)
            in_specs=[
                pl.BlockSpec((1, C_in, T_sp), lambda b, s: (b, 0, s)),
                pl.BlockSpec((C_feat, C_in), lambda b, s: (0, 0)),
                pl.BlockSpec((C_feat, N_PAD), lambda b, s: (0, 0)),
                pl.BlockSpec((1, N_PAD), lambda b, s: (0, 0)),
            ],
            out_specs=pl.BlockSpec((1, 1, N_PAD), lambda b, s: (b, 0, 0)),
            scratch_shapes=[pltpu.VMEM((1, C_feat), jnp.float32)],
        ),
        compiler_params=pltpu.CompilerParams(
            dimension_semantics=("parallel", "arbitrary")),
    )(x_flat, w_conv_t, w_cls_pad, b_cls_pad)

    return out_pad[:, 0, :n_classes]


if __name__ == "__main__":
    # Small shapes consistent with the forward pass:
    #   input image:  (B=2, C_in=4, H=16, W=16)
    #   backbone feature channels (stand-in for _fc.in_features): 32
    #   classifier:   Linear(32 -> 5)
    B, C_in, H, W = 2, 4, 16, 16
    C_feat, n_classes = 32, 5

    key = jax.random.PRNGKey(0)
    kx, kwc, kwl, kbl = jax.random.split(key, 4)

    x = jax.random.normal(kx, (B, C_in, H, W), dtype=jnp.float32)
    w_conv = jax.random.normal(kwc, (C_in, C_feat), dtype=jnp.float32) * 0.1
    w_cls = jax.random.normal(kwl, (C_feat, n_classes), dtype=jnp.float32) * 0.1
    b_cls = jax.random.normal(kbl, (n_classes,), dtype=jnp.float32) * 0.1

    out = net_forward(x, w_conv, w_cls, b_cls)
    out = jax.block_until_ready(out)

    # pure-JAX reference check
    x_ref = jnp.transpose(x, (0, 2, 3, 1)).reshape(B, H * W, C_in)
    feat = jnp.maximum(jnp.einsum("bpc,cf->bpf", x_ref, w_conv), 0.0)
    pooled = jnp.mean(feat, axis=1)                     # (B, C_feat)
    ref = pooled @ w_cls + b_cls                        # (B, 5)
    assert out.shape == (B, n_classes)
    assert jnp.allclose(out, ref, rtol=1e-4, atol=1e-4), \
        f"max abs err {jnp.max(jnp.abs(out - ref))}"

    print("KERNEL_OK")
</pallas_src>

<mosaic_0001>
module attributes {stable_mosaic.version = 11 : i64} {
  func.func @_net_kernel(%arg0: i32, %arg1: i32, %arg2: memref<1x4x256xf32, #tpu.memory_space<vmem>>, %arg3: memref<32x4xf32, #tpu.memory_space<vmem>>, %arg4: memref<32x128xf32, #tpu.memory_space<vmem>>, %arg5: memref<1x128xf32, #tpu.memory_space<vmem>>, %arg6: memref<1x1x128xf32, #tpu.memory_space<vmem>>, %arg7: memref<1x32xf32, #tpu.memory_space<vmem>>) attributes {dimension_semantics = [#tpu.dimension_semantics<parallel>, #tpu.dimension_semantics<arbitrary>], iteration_bounds = array<i64: 2, 1>, scalar_prefetch = 0 : i64, scratch_operands = 1 : i64, tpu.core_type = #tpu.core_type<tc>, window_params = [{transform_indices = @transform_0, window_bounds = array<i64: 1, 4, 256>}, {pipeline_mode = #tpu.pipeline_mode<synchronous>, transform_indices = @transform_1, window_bounds = array<i64: 32, 4>}, {pipeline_mode = #tpu.pipeline_mode<synchronous>, transform_indices = @transform_2, window_bounds = array<i64: 32, 128>}, {pipeline_mode = #tpu.pipeline_mode<synchronous>, transform_indices = @transform_3, window_bounds = array<i64: 1, 128>}, {transform_indices = @transform_4, window_bounds = array<i64: 1, 1, 128>}]} {
    %c0_i32 = arith.constant 0 : i32
    %0 = arith.cmpi eq, %arg1, %c0_i32 : i32
    %1 = arith.extui %0 : i1 to i32
    %c0_i32_0 = arith.constant 0 : i32
    %2 = arith.cmpi ne, %1, %c0_i32_0 : i32
    scf.if %2 {
      %cst_14 = arith.constant 0.000000e+00 : f32
      %17 = vector.broadcast %cst_14 : f32 to vector<1x32xf32>
      %c0_15 = arith.constant 0 : index
      %c0_16 = arith.constant 0 : index
      %18 = vector.load %arg7[%c0_15, %c0_16] : memref<1x32xf32, #tpu.memory_space<vmem>>, vector<1x32xf32>
      tpu.vector_store %arg7[%c0_15, %c0_16], %17 {strides = array<i32>} : memref<1x32xf32, #tpu.memory_space<vmem>>, vector<1x32xf32>,
    } else {
    }
    %c0 = arith.constant 0 : index
    %c0_1 = arith.constant 0 : index
    %c0_2 = arith.constant 0 : index
    %3 = vector.load %arg2[%c0, %c0_1, %c0_2] : memref<1x4x256xf32, #tpu.memory_space<vmem>>, vector<1x4x256xf32>
    %4 = vector.shape_cast %3 : vector<1x4x256xf32> to vector<4x256xf32>
    %c0_3 = arith.constant 0 : index
    %c0_4 = arith.constant 0 : index
    %5 = vector.load %arg3[%c0_3, %c0_4] : memref<32x4xf32, #tpu.memory_space<vmem>>, vector<32x4xf32>
    %cst = arith.constant dense<0.000000e+00> : vector<32x256xf32>
    %6 = tpu.matmul %5, %4, %cst {dimension_numbers = #tpu.dot_dimension_numbers<[1], [0], [0], [1], [0, 0, 1, 1], [], []>} : vector<32x4xf32>, vector<4x256xf32>, vector<32x256xf32> -> vector<32x256xf32>
    %cst_5 = arith.constant 0.000000e+00 : f32
    %7 = vector.broadcast %cst_5 : f32 to vector<32x256xf32>
    %8 = arith.maximumf %6, %7 : vector<32x256xf32>
    %cst_6 = arith.constant 1.000000e+00 : f32
    %9 = vector.broadcast %cst_6 : f32 to vector<1x256xf32>
    %cst_7 = arith.constant dense<0.000000e+00> : vector<1x32xf32>
    %10 = tpu.matmul %9, %8, %cst_7 {dimension_numbers = #tpu.dot_dimension_numbers<[1], [1], [0], [0], [0, 0, 1, 0], [], []>} : vector<1x256xf32>, vector<32x256xf32>, vector<1x32xf32> -> vector<1x32xf32>
    %c0_8 = arith.constant 0 : index
    %c0_9 = arith.constant 0 : index
    %11 = vector.load %arg7[%c0_8, %c0_9] : memref<1x32xf32, #tpu.memory_space<vmem>>, vector<1x32xf32>
    %12 = arith.addf %11, %10 : vector<1x32xf32>
    %c0_10 = arith.constant 0 : index
    %c0_11 = arith.constant 0 : index
    %13 = vector.load %arg7[%c0_10, %c0_11] : memref<1x32xf32, #tpu.memory_space<vmem>>, vector<1x32xf32>
    tpu.vector_store %arg7[%c0_10, %c0_11], %12 {strides = array<i32>} : memref<1x32xf32, #tpu.memory_space<vmem>>, vector<1x32xf32>,
    %c0_i32_12 = arith.constant 0 : i32
    %14 = arith.cmpi eq, %arg1, %c0_i32_12 : i32
    %15 = arith.extui %14 : i1 to i32
    %c0_i32_13 = arith.constant 0 : i32
    %16 = arith.cmpi ne, %15, %c0_i32_13 : i32
    scf.if %16 {
      %c0_14 = arith.constant 0 : index
      %c0_15 = arith.constant 0 : index
      %17 = vector.load %arg7[%c0_14, %c0_15] : memref<1x32xf32, #tpu.memory_space<vmem>>, vector<1x32xf32>
      %cst_16 = arith.constant 3.906250e-03 : f32
      %18 = vector.broadcast %cst_16 : f32 to vector<1x32xf32>
      %19 = arith.mulf %17, %18 : vector<1x32xf32>
      %c0_17 = arith.constant 0 : index
      %c0_18 = arith.constant 0 : index
      %20 = vector.load %arg4[%c0_17, %c0_18] : memref<32x128xf32, #tpu.memory_space<vmem>>, vector<32x128xf32>
      %cst_19 = arith.constant dense<0.000000e+00> : vector<1x128xf32>
      %21 = tpu.matmul %19, %20, %cst_19 {dimension_numbers = #tpu.dot_dimension_numbers<[1], [0], [0], [1], [0, 0, 1, 1], [], []>} : vector<1x32xf32>, vector<32x128xf32>, vector<1x128xf32> -> vector<1x128xf32>
      %c0_20 = arith.constant 0 : index
      %c0_21 = arith.constant 0 : index
      %22 = vector.load %arg5[%c0_20, %c0_21] : memref<1x128xf32, #tpu.memory_space<vmem>>, vector<1x128xf32>
      %23 = arith.addf %21, %22 : vector<1x128xf32>
      %c0_22 = arith.constant 0 : index
      %c0_23 = arith.constant 0 : index
      %c0_24 = arith.constant 0 : index
      %24 = vector.load %arg6[%c0_22, %c0_23, %c0_24] : memref<1x1x128xf32, #tpu.memory_space<vmem>>, vector<1x1x128xf32>
      %25 = vector.shape_cast %24 : vector<1x1x128xf32> to vector<1x128xf32>
      %26 = vector.shape_cast %23 : vector<1x128xf32> to vector<1x1x128xf32>
      tpu.vector_store %arg6[%c0_22, %c0_23, %c0_24], %26 {strides = array<i32>} : memref<1x1x128xf32, #tpu.memory_space<vmem>>, vector<1x1x128xf32>,
    } else {
    }
    return
  }
  func.func @transform_0(%arg0: i32, %arg1: i32) -> (i32, i32, i32) {
    %c0_i32 = arith.constant 0 : i32
    %c0_i32_0 = arith.constant 0 : i32
    return %arg0, %c0_i32, %arg1 : i32, i32, i32
  }
  func.func @transform_1(%arg0: i32, %arg1: i32) -> (i32, i32) {
    %c0_i32 = arith.constant 0 : i32
    %c0_i32_0 = arith.constant 0 : i32
    %c0_i32_1 = arith.constant 0 : i32
    return %c0_i32, %c0_i32_0 : i32, i32
  }
  func.func @transform_2(%arg0: i32, %arg1: i32) -> (i32, i32) {
    %c0_i32 = arith.constant 0 : i32
    %c0_i32_0 = arith.constant 0 : i32
    %c0_i32_1 = arith.constant 0 : i32
    return %c0_i32, %c0_i32_0 : i32, i32
  }
  func.func @transform_3(%arg0: i32, %arg1: i32) -> (i32, i32) {
    %c0_i32 = arith.constant 0 : i32
    %c0_i32_0 = arith.constant 0 : i32
    %c0_i32_1 = arith.constant 0 : i32
    return %c0_i32, %c0_i32_0 : i32, i32
  }
  func.func @transform_4(%arg0: i32, %arg1: i32) -> (i32, i32, i32) {
    %c0_i32 = arith.constant 0 : i32
    %c0_i32_0 = arith.constant 0 : i32
    %c0_i32_1 = arith.constant 0 : i32
    return %arg0, %c0_i32, %c0_i32_0 : i32, i32, i32
  }
}

</mosaic_0001>

<bundles_post_ra>
// kernel: net_forward.1
= control target key start
LH: loop header
LB: loop body
LE: loop exit
PB: predicated region body
PF: predicated region fallthrough
CT: control target
= control target key end

     0   :  { %9 = vsyncpa [#allocation4], 0  ;;  %s951_s0 = inlined_call_operand.vmem [shape: f32[2,4,256], index: 0, kind: input, shape index: {}]   ;;  %s952_s1 = inlined_call_operand.vmem [shape: f32[32,4], index: 1, kind: input, shape index: {}]   ;;  %s953_s2 = inlined_call_operand.vmem [shape: f32[32,128], index: 2, kind: input, shape index: {}]   ;;  %s954_s3 = inlined_call_operand.vmem [shape: f32[1,128], index: 3, kind: input, shape index: {}]   ;;  %s955_s4 = inlined_call_operand.hbm [shape: f32[2,1,128], index: 4, kind: output, shape index: {}]  }
   0x1   :  { %11 = vsyncpa [#allocation4 + $0x1], 0  ;;  %s810_s15 = smov 0   ;;  %s812_s16 = smov 0  }
   0x2   :  { %s814_s17 = smov 0   ;;  %s816_s18 = smov 0  }
   0x3   :  { %s818_s19 = smov 0   ;;  %s820_s20 = smov 0  }
   0x4 LB: > { %s592_s21 = sadd.s32 4294967295, %s778_s20   ;;  %s593_s22 = sadd.s32 4294967294, %s778_s20   ;;  %s778_s20 = sphi %s820_s20, %s17_s20   ;;  %s774_s19 = sphi %s818_s19, %s962_s19   ;;  %s770_s18 = sphi %s816_s18, %s961_s18   ;;  %s766_s17 = sphi %s814_s17, %s960_s17   ;;  %s762_s16 = sphi %s812_s16, %s959_s16   ;;  %s758_s15 = sphi %s810_s15, %s958_s15  }
   0x5   : > { %s29_s23 = sadd.s32 1, %s774_s19  ;;  %s127_s24 = sadd.s32 1, %s766_s17 }
   0x6   : > { %p31_p0 = scmp.ge.s32.totalorder %s29_s23, 2  ;;  %p137_p1 = scmp.ne.s32.totalorder %s766_s17, %s762_s16 }
   0x7   : > { %p138_p2 = scmp.eq.s32.totalorder %s592_s21, 1  ;;  %p143_p3 = scmp.ne.s32.totalorder %s762_s16, %s758_s15 }
   0x8   : > { %s964_s23 = smov (%p31_p0, %s29_s23), 0  ;;  %p144_p5 = scmp.eq.s32.totalorder %s593_s22, 1 }
   0x9   : > { %p850_p4 = por %p138_p2, %p137_p1  ;;  %s124_s26 = ssub.s32 %s774_s19, %s964_s23 }
   0xa   : > { %p596_p6 = scmp.ge.s32.totalorder %s778_s20, 1  ;;  %p125_p7 = scmp.eq.s32.totalorder %s124_s26, 0 }
   0xb   : > { %p857_p8 = por %p144_p5, %p143_p3  ;;  %p184_p9 = scmp.lt.s32.totalorder %s778_s20, 3 }
   0xc   : > { %s863_s28 = scalar_select %p125_p7, %s766_s17, %s127_s24  }
   0xd   : > { %p185_p10 = pnand %p596_p6, %p184_p9 }
   0xe   : > { %p214_p11 = scmp.lt.s32.totalorder (!%p185_p10), %s770_s18, 1  ;;  %v780_v0 = vmov (!%p185_p10), 0.0   ;;  %vm249_vm0 = vcmask (!%p185_p10), 1043456   ;;  %v230_v3 = vld [vmem:[%s952_s1] sm:$0xff] (!%p185_p10)  ;;  %vm236_vm1 = vcmask (!%p185_p10), 31744   ;;  %v231_v4 = vld [vmem:[%s952_s1 + $0x8] sm:$0xff] (!%p185_p10) }
   0xf   : > { %188 = sbr.rel (%p185_p10) target bundleno = 720 (0x2d0), region = 36  ;;  %318 = vmatprep.mubr.f32.mxu0 (!%p185_p10), %v780_v0  ;;  %v232_v5 = vld [vmem:[%s952_s1 + $0x10] sm:$0xff] (!%p185_p10)  ;;  %v233_v6 = vld [vmem:[%s952_s1 + $0x18] sm:$0xff] (!%p185_p10)  ;;  %v781_v7 = vmov (!%p185_p10), 1.0   ;;  %v430_v8 = vld [vmem:[%s953_s2] sm:$0xff] (!%p185_p10)  ;;  %vm227_vm2 = vcmask (!%p185_p10), 253952  }
  0x10   : > { %415 = vmatprep.mubr.f32.mxu1 (!%p185_p10), %v781_v7  ;;  %v431_v9 = vld [vmem:[%s953_s2 + $0x8] sm:$0xff] (!%p185_p10)  ;;  %v782_v10 = vmov (!%p185_p10), 0.0|0.0   ;;  %228 = vst.msk [vmem:[#allocation2] sm:$0x1] (!%p185_p10), %vm227_vm2, %v780_v0  ;;  %v432_v32 = vld [vmem:[%s953_s2 + $0x10] sm:$0xff] (!%p185_p10)  ;;  %v433_v33 = vld [vmem:[%s953_s2 + $0x18] sm:$0xff] (!%p185_p10) }
  0x11   : > { %v635_v11 = vpack.c.bf16 (!%p185_p10), %v431_v9, %v430_v8  ;;  %v638_v34 = vpack.c.bf16 (!%p185_p10), %v433_v33, %v432_v32  ;;  %vm783_vm3 = vmmov (!%p185_p10), 0   ;;  %vm435_vm4 = vcmask (!%p185_p10), 261120   ;;  %s211_s8 = sand.u32 (!%p185_p10), 1, %s762_s16   ;;  %v434_v41 = vld [vmem:[%s954_s3] sm:$0x1] (!%p185_p10)  ;;  %s606_s11 = sshll.u32 (!%p185_p10), %s770_s18, 4 }
  0x12   : > { %s212_s12 = scalar_lea.vmem (!%p185_p10), [#allocation3], %s211_s8  ;;  %s904_s22 = scalar_lea.hbm (!%p185_p10), %s955_s4, %s606_s11 }
  0x13   : > { %s523_s13 = sshll.u32 (!%p185_p10), %s212_s12, 4  ;;  %s511_s24 = scalar_lea.sflag (!%p185_p10), [#allocation4], %s211_s8  ;;  %s906_s13 = int_to_ptr.vmem [resolvable:$true] %s523_s13 }
  0x14   : > { %s700_s26 = scalar_lea.vmem (!%p185_p10), %s906_s13, 16 }
  0x15   : > { %p701_p12 = scmp.ne.s32.totalorder (!%p185_p10), %s906_s13, %s700_s26 }
  0x16   : > { %s215_s29 = scalar_select %p214_p11, %s770_s18, 1 }
  0x17   : > { %v421_v35 = vld [vmem:[#allocation2] sm:$0x1]  ;;  %p702_p13 = pnand %p701_p12, %p850_p4  ;;  %s784_s18 = smov [#allocation3]  }
  0x18   : > { %s609_s30 = sshll.u32 %s215_s29, 3  ;;  %s704_s29 = sshll.u32 %s784_s18, 4  ;;  %s705_s29 = int_to_ptr.vmem [resolvable:$false] %s704_s29 }
  0x19   : > { %s221_s7 = scalar_lea.vmem %s951_s0, %s609_s30  ;;  %p703_p0 = pneg %p702_p13 }
  0x1a   : > { %v229_v1 = vld [vmem:[%s221_s7] sm:$0xff]  ;;  %s706_s30 = scalar_lea.vmem %s705_s29, 32  ;;  %p707_p1 = scmp.lt.s32.totalorder %s906_s13, %s705_s29 }
  0x1b   : > { %v235_v2 = vcombine.high %v229_v1, %v229_v1  ;;  %p708_p2 = scmp.lt.s32.totalorder %s706_s30, %s700_s26 }
  0x1d   : > { %599 = vmatprep.subr.msk.mxu0 %vm249_vm0, %v235_v2  ;;  %p709_p3 = por %p708_p2, %p707_p1 }
  0x1e   : > { %600 = vmatpush1.msk.msra.mxu0 %vm249_vm0, %v229_v1 }
  0x1f   : > { %601 = vmatmul.mubr.msk.f32.vlgmr.msra.gmra.mrb[0].mxu0 %vm236_vm1, %v230_v3  ;;  %634 = vmatprep.subr.bf16.mxu0 %v782_v10  ;;  %p710_p5 = pnand %p709_p3, %p703_p0 }
  0x20   : > { %324 = vmatprep.mubr.f32.mxu0 %v780_v0  ;;  %636 = vmatpush3.bf16.msra.mxu0 %v635_v11 }
  0x21   : > { %637 = vmatprep.subr.bf16.mxu0 %v782_v10 }
  0x23   : > { %602 = vmatmul.mubr.msk.f32.gmra.mrb[2].mxu0 %vm236_vm1, %v231_v4 }
  0x24   : > { %330 = vmatprep.mubr.f32.mxu0 %v780_v0  ;;  %639 = vmatpush3.bf16.msra.mxu0 %v638_v34 }
  0x27   : > { %603 = vmatmul.mubr.msk.f32.gmra.mrb[4].mxu0 %vm236_vm1, %v232_v5 }
  0x28   : > { %336 = vmatprep.mubr.f32.mxu0 %v780_v0 }
  0x2b   : > { %604 = vmatmul.mubr.msk.f32.gmra.mrb[6].mxu0 %vm236_vm1, %v233_v6 }
  0x2c   : > { %623 = vmatprep.mubr.msk.f32.mxu0 %vm783_vm3, %v780_v0 }
  0xf2   : > { %v320_v12 = vpop.f32.mrb[0].mxu0 }
  0xf3   : > { %v322_v13 = vpop.f32.mrb[1].mxu0  ;;  %v343_v15 = vmax.f32 %v320_v12, 0.0 }
  0xf4   : > { %v344_v18 = vmax.f32 %v322_v13, 0.0 }
  0xf6   : > { %v326_v14 = vpop.f32.mrb[2].mxu0 }
  0xf7   : > { %v345_v16 = vmax.f32 %v326_v14, 0.0  ;;  %v328_v17 = vpop.f32.mrb[3].mxu0 }
  0xf8   : > { %v346_v19 = vmax.f32 %v328_v17, 0.0 }
  0xf9   : > { %v628_v20 = vpack.c.bf16 %v345_v16, %v343_v15 }
  0xfa   : > { %v332_v21 = vpop.f32.mrb[4].mxu0  ;;  %v626_v22 = vpack.c.bf16 %v346_v19, %v344_v18 }
  0xfb   : > { %v334_v23 = vpop.f32.mrb[5].mxu0  ;;  %v347_v25 = vmax.f32 %v332_v21, 0.0 }
  0xfc   : > { %627 = vmatprep.subr.bf16.mxu1 %v626_v22  ;;  %v348_v28 = vmax.f32 %v334_v23, 0.0 }
  0xfd   : > { %629 = vmatpush1.bf16.xpose.msra.mxu1 %v628_v20 }
  0xfe   : > { %v338_v24 = vpop.f32.mrb[6].mxu0 }
  0xff   : > { %v349_v26 = vmax.f32 %v338_v24, 0.0  ;;  %v340_v27 = vpop.f32.mrb[7].mxu0 }
 0x100   : > { %v350_v29 = vmax.f32 %v340_v27, 0.0 }
 0x101   : > { %v632_v30 = vpack.c.bf16 %v349_v26, %v347_v25 }
 0x102   : > { %v630_v31 = vpack.c.bf16 %v350_v29, %v348_v28 }
 0x104   : > { %631 = vmatprep.subr.bf16.mxu1 %v630_v31 }
 0x105   : > { %633 = vmatpush1.bf16.xpose.msra.mxu1 %v632_v30 }
 0x10c   : > { %416 = vmatmul.mubr.f32.vlgmr.msra.gmra.mrb[0].mxu1 %v781_v7 }
 0x1df   : > { %v417_v36 = vpop.f32.mrb[0].mxu1 }
 0x1e0   : > { %v422_v37 = vadd.f32 %v421_v35, %v417_v36  ;;  %v419_v38 = vpop.f32.mrb[1].mxu1 }
 0x1e2   : > { %424 = vst.msk [vmem:[#allocation2] sm:$0x1] %vm227_vm2, %v422_v37 }
 0x1e9   : > { %v428_v39 = vld [vmem:[#allocation2] sm:$0x1] }
 0x1ea   : > { %v429_v40 = vmul.f32 0.00390625, %v428_v39 }
 0x1ec   : > { %624 = vmatmul.mubr.msk.f32.vlgmr.msra.gmra.mrb[8].mxu0 %vm435_vm4, %v429_v40 }
 0x2bf   : > { %v505_v42 = vpop.f32.mrb[8].mxu0 }
 0x2c0   : > { %v506_v43 = vadd.f32 %v505_v42, %v434_v41  ;;  %v625_v44 = vpop.f32.mrb[9].mxu0 }
 0x2c2   : > { %509 = vst [vmem:[%s212_s12] sm:$0x1] %v506_v43 }
 0x2c3   : > { %713 = shalt.err (!%p710_p5)
}
 0x2c4   : > { %s714_s5 = scalar_lea.hbm %s904_s22, 16  ;;  %s718_s8 = scalar_lea.hbm %s955_s4, 32 }
 0x2c5   : > { %p715_p6 = scmp.ne.s32.totalorder %s904_s22, %s714_s5  ;;  %p719_p10 = scmp.lt.u32.totalorder %s904_s22, %s955_s4 }
 0x2c6   : > { %p720_p11 = scmp.lt.u32.totalorder %s718_s8, %s714_s5  ;;  %p722_p13 = scmp.lt.u32.totalorder %s714_s5, %s904_s22 }
 0x2c7   : > { %p716_p7 = pnand %p715_p6, %p850_p4 }
 0x2c8   : > { %p721_p12 = por %p720_p11, %p719_p10 }
 0x2c9   : > { %p717_p9 = pneg %p716_p7 }
 0x2ca   : > { %p723_p0 = por %p722_p13, %p721_p12 }
 0x2cc   : > { %p724_p1 = pnand %p723_p0, %p717_p9 }
 0x2ce   : > { %727 = shalt.err (!%p724_p1)
}
 0x2cf   : > { %640 = dma.vmem_to_hbm [thread:$0]  (%p850_p4), %s906_s13, 16, %s904_s22, %s511_s24  }
 0x2d0 PF: > { %p646_p2 = scmp.ge.s32.totalorder %s778_s20, 2  ;;  %s535_s11 = sand.u32 1, %s758_s15  }
 0x2d1   : > { %s536_s12 = scalar_lea.sflag [#allocation4], %s535_s11 }
 0x2d2   : > { %p643_p3 = pnand %p646_p2, %p857_p8 }
 0x2d4   : > { %753 = dma.done.wait (!%p643_p3), %s536_s12, 16  }
 0x2d5   : > { %755 = vsyncadd (!%p643_p3), %s536_s12, 4294967280  ;;  %s17_s20 = sadd.s32 1, %s778_s20   ;;  %s958_s15 = smov %s762_s16 }
 0x2d6   : > { %p14_p5 = scmp.ge.s32.totalorder %s17_s20, 4   ;;  %s959_s16 = smov %s766_s17 }
 0x2d7   : > { %s960_s17 = smov %s863_s28  ;;  %s961_s18 = smov %s774_s19 }
 0x2d8   : > { %s962_s19 = smov %s964_s23  ;;  %16 = sbr.rel (!%p14_p5) target bundleno = 4 (0x4), region = 79 }
 0x2df   :  { %540 = vsyncpa [#allocation4], 1 }
 0x2e0   :  { %542 = vsyncpa [#allocation4 + $0x1], 1 }

</bundles_post_ra>
